<compile_context>
chip_gen: v7x
topology: tpu7x:2x2x1
jax: 0.10.0
libtpu: 0.0.40
codegen_flags: <defaults>
</compile_context>

<pallas_src>
import functools

import numpy as np
import jax
import jax.numpy as jnp
from jax import lax
from jax.experimental import pallas as pl
from jax.experimental.pallas import tpu as pltpu


def _attention_pool_kernel(tok_ref, wkvq_ref, prb_ref, pm_ref, r_ref, rseg_ref,
                           wc_ref, bc_ref, out_ref, *, num_heads):
    B, HW, C = tok_ref.shape
    HD = C // num_heads
    scale = float(HD) ** -0.5
    C3 = 3 * C

    # ---- fused q/k/v projection of ALL tokens in the block:
    #      one (B*HW, C) x (C, 3C) bf16 MXU matmul, f32 accumulation. ----
    xf = tok_ref[...].reshape(B * HW, C)                                  # bf16
    praw = jnp.dot(xf, wkvq_ref[...], preferred_element_type=jnp.float32)  # (B*HW, 3C) f32
    # prb = pos_rest @ W + b  (precomputed): by linearity this equals projecting
    # (x + pos_rest) with bias, but keeps the positional/bias part exact f32.
    p3 = praw.reshape(B, HW, C3) + prb_ref[...][None]                     # (B, HW, 3C)
    p_flat = p3.reshape(B * HW, C3)

    # ---- mean-token (query) projection by linearity: segment-mean on the MXU.
    #      proj(mean(x) + pos_mean) = mean_i proj(x_i + pos_rest_i) + pm_proj ----
    rseg = rseg_ref[...]                                                  # (B, B*HW) ones blocks
    p0 = jnp.dot(rseg, p_flat, preferred_element_type=jnp.float32) * (1.0 / HW) \
        + pm_ref[...]                                                     # (B, 3C)

    k0 = p0[:, 0:C]                                                       # (B, C)
    v0 = p0[:, C:2 * C]                                                   # (B, C)
    q = p0[:, 2 * C:] * scale            # torch scales q (incl. bias) by head_dim**-0.5
    k3 = p3[:, :, 0:C]                                                    # (B, HW, C)
    v_flat = p_flat[:, C:2 * C]                                           # (B*HW, C)

    # ---- per-head scores via block-diagonal head-reduction matrix R (C, H) ----
    R = r_ref[...]
    qk = (k3 * q[:, None, :]).reshape(B * HW, C)
    s_sp = jnp.dot(qk, R, preferred_element_type=jnp.float32)             # (B*HW, H)
    s0 = jnp.dot(k0 * q, R, preferred_element_type=jnp.float32)           # (B, H)

    # ---- softmax over the HW+1 key positions, per batch / per head ----
    s_sp3 = s_sp.reshape(B, HW, num_heads)
    m = jnp.maximum(jnp.max(s_sp3, axis=1), s0)                           # (B, H)
    e0 = jnp.exp(s0 - m)                                                  # (B, H)
    e_sp3 = jnp.exp(s_sp3 - m[:, None, :])                                # (B, HW, H)
    e_sp = e_sp3.reshape(B * HW, num_heads)
    denom = e0 + jnp.dot(rseg, e_sp, preferred_element_type=jnp.float32)  # (B, H)
    inv = pl.reciprocal(denom, approx=False)      # exact: weights sum to 1 (review note)
    w0 = e0 * inv                                                         # (B, H)
    w_sp = (e_sp3 * inv[:, None, :]).reshape(B * HW, num_heads)           # (B*HW, H)

    # ---- expand per-head weights to channel width (w @ R^T), mix V; the sum
    #      over key positions runs on the MXU (rseg), not as an XLU reduction ----
    cdims = (((1,), (1,)), ((), ()))                      # contract the head axis
    w0_full = lax.dot_general(w0, R, cdims, preferred_element_type=jnp.float32)     # (B, C)
    w_sp_full = lax.dot_general(w_sp, R, cdims, preferred_element_type=jnp.float32)  # (B*HW, C)
    attn = w0_full * v0 + jnp.dot(rseg, w_sp_full * v_flat,
                                  preferred_element_type=jnp.float32)     # (B, C)

    # ---- output projection (c_proj): bf16 MXU operands, f32 accumulate ----
    out = jnp.dot(attn.astype(jnp.bfloat16), wc_ref[...],
                  preferred_element_type=jnp.float32) + bc_ref[...]       # (B, OUT)
    out_ref[...] = out[None]


def prepare_params(params, num_heads):
    """One-time preparation of every weight-derived constant (kept OUT of the
    per-call hot path, per the performance review)."""
    C = params["wk"].shape[0]
    HD = C // num_heads
    pos = params["pos"]                                   # (HW+1, C)
    pos_mean, pos_rest = pos[0:1], pos[1:]

    # fused projection weight [Wk^T | Wv^T | Wq^T] : (C, 3C)
    w_kvq = jnp.concatenate([params["wk"].T, params["wv"].T, params["wq"].T], axis=1)
    b_kvq = jnp.concatenate([params["bk"], params["bv"], params["bq"]]).reshape(1, 3 * C)

    # positional embedding folded into the projection by linearity (exact f32):
    prb = pos_rest @ w_kvq + b_kvq                                       # (HW, 3C)
    pm_proj = (pos_mean - jnp.mean(pos_rest, axis=0, keepdims=True)) @ w_kvq  # (1, 3C)

    # block-diagonal head-reduction matrix R[c, h] = 1 iff channel c is in head h
    R = jnp.asarray(np.kron(np.eye(num_heads, dtype=np.float32),
                            np.ones((HD, 1), np.float32)))               # (C, H)

    return {
        "w_kvq": w_kvq.astype(jnp.bfloat16),      # MXU operand -> bf16 (halves DMA)
        "prb": prb.astype(jnp.float32),
        "pm_proj": pm_proj.astype(jnp.float32),
        "R": R,
        "wc": params["wc"].T.astype(jnp.bfloat16),   # (C, OUT), pre-transposed, bf16
        "bc": params["bc"].reshape(1, -1).astype(jnp.float32),
    }


@functools.partial(jax.jit, static_argnames=("num_heads", "num_blocks"))
def attention_pool_2d(x, prep, *, num_heads, num_blocks=1):
    """x: (N, C, H, W) -> (N, OUT). `prep` comes from prepare_params (run once).

    num_blocks=1: whole batch in one grid step (best on single-TC v5e/v6e).
    num_blocks=2: one step per TensorCore on v7x (dimension_semantics="parallel")."""
    N, C, Hs, Ws = x.shape
    HW = Hs * Ws
    OUT = prep["wc"].shape[1]
    G = num_blocks if (num_blocks > 0 and N % num_blocks == 0) else 1
    B = N // G

    # Only per-call data movement: NCHW -> (N, HW, C) tokens + bf16 cast
    # (one fused XLA op under this jit).
    x_seq = jnp.transpose(x.reshape(N, C, HW), (0, 2, 1)).astype(jnp.bfloat16)

    # Segment-sum matrix (B, B*HW) of ones blocks, built from numpy at trace
    # time -> compile-time constant, zero per-call cost.
    rseg = jnp.asarray(np.kron(np.eye(B, dtype=np.float32),
                               np.ones((1, HW), np.float32)))

    kernel = functools.partial(_attention_pool_kernel, num_heads=num_heads)

    flops = int(2 * N * HW * C * 3 * C            # fused projection
                + 2 * N * B * HW * 3 * C          # segment-mean for the query token
                + 4 * N * HW * C * num_heads      # scores + weight expansion
                + 2 * N * HW * C                  # attention mix
                + 2 * N * C * OUT)                # c_proj
    bytes_accessed = int(2 * x_seq.size + 2 * prep["w_kvq"].size + 2 * prep["wc"].size
                         + 4 * (prep["prb"].size + prep["pm_proj"].size + prep["R"].size
                                + rseg.size + prep["bc"].size + N * OUT))
    transcendentals = int(N * (HW + 1) * num_heads)

    out = pl.pallas_call(
        kernel,
        out_shape=jax.ShapeDtypeStruct((G, B, OUT), jnp.float32),
        grid=(G,),
        in_specs=[
            pl.BlockSpec((B, HW, C), lambda g: (g, 0, 0)),       # tokens of this block (bf16)
            pl.BlockSpec((C, 3 * C), lambda g: (0, 0)),          # fused kvq weight (bf16)
            pl.BlockSpec((HW, 3 * C), lambda g: (0, 0)),         # pos_rest @ W + bias (f32)
            pl.BlockSpec((1, 3 * C), lambda g: (0, 0)),          # mean-token pos term (f32)
            pl.BlockSpec((C, num_heads), lambda g: (0, 0)),      # head-reduction matrix R
            pl.BlockSpec((B, B * HW), lambda g: (0, 0)),         # segment-sum matrix
            pl.BlockSpec((C, OUT), lambda g: (0, 0)),            # c_proj weight (bf16, pre-T)
            pl.BlockSpec((1, OUT), lambda g: (0, 0)),            # c_proj bias
        ],
        out_specs=pl.BlockSpec((1, B, OUT), lambda g: (g, 0, 0)),
        compiler_params=pltpu.CompilerParams(dimension_semantics=("parallel",)),
        cost_estimate=pl.CostEstimate(flops=flops, transcendentals=transcendentals,
                                      bytes_accessed=bytes_accessed),
    )(x_seq, prep["w_kvq"], prep["prb"], prep["pm_proj"], prep["R"], rseg,
      prep["wc"], prep["bc"])
    return out.reshape(N, OUT)


def reference(x, params, num_heads):
    """Pure-JAX f32 replica of torch AttentionPool2d.forward (separate proj weights)."""
    N, C, H, W = x.shape
    HW = H * W
    hd = C // num_heads
    scale = hd ** -0.5
    xs = jnp.transpose(x.reshape(N, C, HW), (2, 0, 1))                     # (HW, N, C)
    xs = jnp.concatenate([xs.mean(axis=0, keepdims=True), xs], axis=0)     # (L, N, C)
    xs = xs + params["pos"][:, None, :]
    L = HW + 1
    q = xs[:1] @ params["wq"].T + params["bq"]
    k = xs @ params["wk"].T + params["bk"]
    v = xs @ params["wv"].T + params["bv"]
    qh = q.reshape(1, N, num_heads, hd)
    kh = k.reshape(L, N, num_heads, hd)
    vh = v.reshape(L, N, num_heads, hd)
    s = jnp.einsum('qnhd,knhd->nhqk', qh * scale, kh)
    p = jax.nn.softmax(s, axis=-1)
    o = jnp.einsum('nhqk,knhd->qnhd', p, vh).reshape(1, N, C)[0]           # (N, C)
    return o @ params["wc"].T + params["bc"]


if __name__ == "__main__":
    SPACIAL = 8      # spatial side -> 8*8 = 64 tokens (+1 mean/query token)
    EMBED = 64       # embed_dim
    HEADS = 4        # num_heads (head_dim = 16)
    OUT = 64         # output_dim
    N = 2            # batch

    key = jax.random.PRNGKey(0)
    ks = jax.random.split(key, 10)

    x = jax.random.normal(ks[0], (N, EMBED, SPACIAL, SPACIAL), jnp.float32)
    params = {
        "pos": jax.random.normal(ks[1], (SPACIAL * SPACIAL + 1, EMBED),
                                 jnp.float32) / (EMBED ** 0.5),
        "wq": jax.random.normal(ks[2], (EMBED, EMBED), jnp.float32) * 0.05,
        "bq": jax.random.normal(ks[3], (EMBED,), jnp.float32) * 0.05,
        "wk": jax.random.normal(ks[4], (EMBED, EMBED), jnp.float32) * 0.05,
        "bk": jax.random.normal(ks[5], (EMBED,), jnp.float32) * 0.05,
        "wv": jax.random.normal(ks[6], (EMBED, EMBED), jnp.float32) * 0.05,
        "bv": jax.random.normal(ks[7], (EMBED,), jnp.float32) * 0.05,
        "wc": jax.random.normal(ks[8], (OUT, EMBED), jnp.float32) * 0.05,
        "bc": jax.random.normal(ks[9], (OUT,), jnp.float32) * 0.05,
    }

    prep = prepare_params(params, HEADS)              # one-time, out of hot path
    jax.block_until_ready(jax.tree_util.tree_leaves(prep))

    z = attention_pool_2d(x, prep, num_heads=HEADS)   # num_blocks=1 (single-TC default)
    jax.block_until_ready(z)

    z_ref = reference(x, params, HEADS)
    assert z.shape == (N, OUT)
    # tolerance sized for bf16 MXU operands (f32 accumulation, f32 softmax)
    assert jnp.allclose(z, z_ref, atol=1e-2, rtol=1e-2), "mismatch vs pure-JAX reference"

    print("KERNEL_OK")
</pallas_src>

<mosaic_0001>
module attributes {stable_mosaic.version = 11 : i64} {
  func.func @_attention_pool_kernel(%arg0: i32, %arg1: memref<2x64x64xbf16, #tpu.memory_space<vmem>>, %arg2: memref<64x192xbf16, #tpu.memory_space<vmem>>, %arg3: memref<64x192xf32, #tpu.memory_space<vmem>>, %arg4: memref<1x192xf32, #tpu.memory_space<vmem>>, %arg5: memref<64x4xf32, #tpu.memory_space<vmem>>, %arg6: memref<2x128xf32, #tpu.memory_space<vmem>>, %arg7: memref<64x64xbf16, #tpu.memory_space<vmem>>, %arg8: memref<1x64xf32, #tpu.memory_space<vmem>>, %arg9: memref<1x2x64xf32, #tpu.memory_space<vmem>>) attributes {dimension_semantics = [#tpu.dimension_semantics<parallel>], iteration_bounds = array<i64: 1>, scalar_prefetch = 0 : i64, scratch_operands = 0 : i64, tpu.core_type = #tpu.core_type<tc>, window_params = [{transform_indices = @transform_0, window_bounds = array<i64: 2, 64, 64>}, {pipeline_mode = #tpu.pipeline_mode<synchronous>, transform_indices = @transform_1, window_bounds = array<i64: 64, 192>}, {pipeline_mode = #tpu.pipeline_mode<synchronous>, transform_indices = @transform_2, window_bounds = array<i64: 64, 192>}, {pipeline_mode = #tpu.pipeline_mode<synchronous>, transform_indices = @transform_3, window_bounds = array<i64: 1, 192>}, {pipeline_mode = #tpu.pipeline_mode<synchronous>, transform_indices = @transform_4, window_bounds = array<i64: 64, 4>}, {pipeline_mode = #tpu.pipeline_mode<synchronous>, transform_indices = @transform_5, window_bounds = array<i64: 2, 128>}, {pipeline_mode = #tpu.pipeline_mode<synchronous>, transform_indices = @transform_6, window_bounds = array<i64: 64, 64>}, {pipeline_mode = #tpu.pipeline_mode<synchronous>, transform_indices = @transform_7, window_bounds = array<i64: 1, 64>}, {transform_indices = @transform_8, window_bounds = array<i64: 1, 2, 64>}]} {
    %c0 = arith.constant 0 : index
    %c0_0 = arith.constant 0 : index
    %c0_1 = arith.constant 0 : index
    %0 = vector.load %arg1[%c0, %c0_0, %c0_1] : memref<2x64x64xbf16, #tpu.memory_space<vmem>>, vector<2x64x64xbf16>
    %1 = vector.shape_cast %0 : vector<2x64x64xbf16> to vector<128x64xbf16>
    %c0_2 = arith.constant 0 : index
    %c0_3 = arith.constant 0 : index
    %2 = vector.load %arg2[%c0_2, %c0_3] : memref<64x192xbf16, #tpu.memory_space<vmem>>, vector<64x192xbf16>
    %cst = arith.constant dense<0.000000e+00> : vector<128x192xf32>
    %3 = tpu.matmul %1, %2, %cst {dimension_numbers = #tpu.dot_dimension_numbers<[1], [0], [0], [1], [0, 0, 1, 1], [], []>} : vector<128x64xbf16>, vector<64x192xbf16>, vector<128x192xf32> -> vector<128x192xf32>
    %4 = vector.shape_cast %3 : vector<128x192xf32> to vector<2x64x192xf32>
    %c0_4 = arith.constant 0 : index
    %c0_5 = arith.constant 0 : index
    %5 = vector.load %arg3[%c0_4, %c0_5] : memref<64x192xf32, #tpu.memory_space<vmem>>, vector<64x192xf32>
    %6 = vector.shape_cast %5 : vector<64x192xf32> to vector<1x64x192xf32>
    %7 = vector.broadcast %6 : vector<1x64x192xf32> to vector<2x64x192xf32>
    %8 = arith.addf %4, %7 : vector<2x64x192xf32>
    %9 = vector.shape_cast %8 : vector<2x64x192xf32> to vector<128x192xf32>
    %c0_6 = arith.constant 0 : index
    %c0_7 = arith.constant 0 : index
    %10 = vector.load %arg6[%c0_6, %c0_7] : memref<2x128xf32, #tpu.memory_space<vmem>>, vector<2x128xf32>
    %cst_8 = arith.constant dense<0.000000e+00> : vector<2x192xf32>
    %11 = tpu.matmul %10, %9, %cst_8 {dimension_numbers = #tpu.dot_dimension_numbers<[1], [0], [0], [1], [0, 0, 1, 1], [], []>} : vector<2x128xf32>, vector<128x192xf32>, vector<2x192xf32> -> vector<2x192xf32>
    %cst_9 = arith.constant 1.562500e-02 : f32
    %12 = vector.broadcast %cst_9 : f32 to vector<2x192xf32>
    %13 = arith.mulf %11, %12 : vector<2x192xf32>
    %c0_10 = arith.constant 0 : index
    %c0_11 = arith.constant 0 : index
    %14 = vector.load %arg4[%c0_10, %c0_11] : memref<1x192xf32, #tpu.memory_space<vmem>>, vector<1x192xf32>
    %15 = vector.broadcast %14 : vector<1x192xf32> to vector<2x192xf32>
    %16 = arith.addf %13, %15 : vector<2x192xf32>
    %17 = vector.extract_strided_slice %16 {offsets = [0, 0], sizes = [2, 64], strides = [1, 1]} : vector<2x192xf32> to vector<2x64xf32>
    %18 = vector.extract_strided_slice %16 {offsets = [0, 64], sizes = [2, 64], strides = [1, 1]} : vector<2x192xf32> to vector<2x64xf32>
    %19 = vector.extract_strided_slice %16 {offsets = [0, 128], sizes = [2, 64], strides = [1, 1]} : vector<2x192xf32> to vector<2x64xf32>
    %cst_12 = arith.constant 2.500000e-01 : f32
    %20 = vector.broadcast %cst_12 : f32 to vector<2x64xf32>
    %21 = arith.mulf %19, %20 : vector<2x64xf32>
    %22 = vector.extract_strided_slice %8 {offsets = [0, 0, 0], sizes = [2, 64, 64], strides = [1, 1, 1]} : vector<2x64x192xf32> to vector<2x64x64xf32>
    %23 = vector.extract_strided_slice %9 {offsets = [0, 64], sizes = [128, 64], strides = [1, 1]} : vector<128x192xf32> to vector<128x64xf32>
    %c0_13 = arith.constant 0 : index
    %c0_14 = arith.constant 0 : index
    %24 = vector.load %arg5[%c0_13, %c0_14] : memref<64x4xf32, #tpu.memory_space<vmem>>, vector<64x4xf32>
    %25 = vector.shape_cast %21 : vector<2x64xf32> to vector<2x1x64xf32>
    %26 = vector.broadcast %25 : vector<2x1x64xf32> to vector<2x64x64xf32>
    %27 = arith.mulf %22, %26 : vector<2x64x64xf32>
    %28 = vector.shape_cast %27 : vector<2x64x64xf32> to vector<128x64xf32>
    %cst_15 = arith.constant dense<0.000000e+00> : vector<128x4xf32>
    %29 = tpu.matmul %28, %24, %cst_15 {dimension_numbers = #tpu.dot_dimension_numbers<[1], [0], [0], [1], [0, 0, 1, 1], [], []>} : vector<128x64xf32>, vector<64x4xf32>, vector<128x4xf32> -> vector<128x4xf32>
    %30 = arith.mulf %17, %21 : vector<2x64xf32>
    %cst_16 = arith.constant dense<0.000000e+00> : vector<2x4xf32>
    %31 = tpu.matmul %30, %24, %cst_16 {dimension_numbers = #tpu.dot_dimension_numbers<[1], [0], [0], [1], [0, 0, 1, 1], [], []>} : vector<2x64xf32>, vector<64x4xf32>, vector<2x4xf32> -> vector<2x4xf32>
    %32 = vector.shape_cast %29 : vector<128x4xf32> to vector<2x64x4xf32>
    %cst_17 = arith.constant dense<0xFF800000> : vector<2x4xf32>
    %33 = vector.multi_reduction <maximumf>, %32, %cst_17 [1] : vector<2x64x4xf32> to vector<2x4xf32>
    %34 = arith.maximumf %33, %31 : vector<2x4xf32>
    %35 = arith.subf %31, %34 : vector<2x4xf32>
    %36 = math.exp %35 : vector<2x4xf32>
    %37 = vector.shape_cast %34 : vector<2x4xf32> to vector<2x1x4xf32>
    %38 = vector.broadcast %37 : vector<2x1x4xf32> to vector<2x64x4xf32>
    %39 = arith.subf %32, %38 : vector<2x64x4xf32>
    %40 = math.exp %39 : vector<2x64x4xf32>
    %41 = vector.shape_cast %40 : vector<2x64x4xf32> to vector<128x4xf32>
    %cst_18 = arith.constant dense<0.000000e+00> : vector<2x4xf32>
    %42 = tpu.matmul %10, %41, %cst_18 {dimension_numbers = #tpu.dot_dimension_numbers<[1], [0], [0], [1], [0, 0, 1, 1], [], []>} : vector<2x128xf32>, vector<128x4xf32>, vector<2x4xf32> -> vector<2x4xf32>
    %43 = arith.addf %36, %42 : vector<2x4xf32>
    %44 = tpu.reciprocal %43 : vector<2x4xf32> -> vector<2x4xf32>
    %45 = arith.mulf %36, %44 : vector<2x4xf32>
    %46 = vector.shape_cast %44 : vector<2x4xf32> to vector<2x1x4xf32>
    %47 = vector.broadcast %46 : vector<2x1x4xf32> to vector<2x64x4xf32>
    %48 = arith.mulf %40, %47 : vector<2x64x4xf32>
    %49 = vector.shape_cast %48 : vector<2x64x4xf32> to vector<128x4xf32>
    %cst_19 = arith.constant dense<0.000000e+00> : vector<2x64xf32>
    %50 = tpu.matmul %45, %24, %cst_19 {dimension_numbers = #tpu.dot_dimension_numbers<[1], [1], [0], [0], [0, 0, 1, 0], [], []>} : vector<2x4xf32>, vector<64x4xf32>, vector<2x64xf32> -> vector<2x64xf32>
    %cst_20 = arith.constant dense<0.000000e+00> : vector<128x64xf32>
    %51 = tpu.matmul %49, %24, %cst_20 {dimension_numbers = #tpu.dot_dimension_numbers<[1], [1], [0], [0], [0, 0, 1, 0], [], []>} : vector<128x4xf32>, vector<64x4xf32>, vector<128x64xf32> -> vector<128x64xf32>
    %52 = arith.mulf %50, %18 : vector<2x64xf32>
    %53 = arith.mulf %51, %23 : vector<128x64xf32>
    %cst_21 = arith.constant dense<0.000000e+00> : vector<2x64xf32>
    %54 = tpu.matmul %10, %53, %cst_21 {dimension_numbers = #tpu.dot_dimension_numbers<[1], [0], [0], [1], [0, 0, 1, 1], [], []>} : vector<2x128xf32>, vector<128x64xf32>, vector<2x64xf32> -> vector<2x64xf32>
    %55 = arith.addf %52, %54 : vector<2x64xf32>
    %56 = arith.truncf %55 : vector<2x64xf32> to vector<2x64xbf16>
    %c0_22 = arith.constant 0 : index
    %c0_23 = arith.constant 0 : index
    %57 = vector.load %arg7[%c0_22, %c0_23] : memref<64x64xbf16, #tpu.memory_space<vmem>>, vector<64x64xbf16>
    %cst_24 = arith.constant dense<0.000000e+00> : vector<2x64xf32>
    %58 = tpu.matmul %56, %57, %cst_24 {dimension_numbers = #tpu.dot_dimension_numbers<[1], [0], [0], [1], [0, 0, 1, 1], [], []>} : vector<2x64xbf16>, vector<64x64xbf16>, vector<2x64xf32> -> vector<2x64xf32>
    %c0_25 = arith.constant 0 : index
    %c0_26 = arith.constant 0 : index
    %59 = vector.load %arg8[%c0_25, %c0_26] : memref<1x64xf32, #tpu.memory_space<vmem>>, vector<1x64xf32>
    %60 = vector.broadcast %59 : vector<1x64xf32> to vector<2x64xf32>
    %61 = arith.addf %58, %60 : vector<2x64xf32>
    %62 = vector.shape_cast %61 : vector<2x64xf32> to vector<1x2x64xf32>
    %c0_27 = arith.constant 0 : index
    %c0_28 = arith.constant 0 : index
    %c0_29 = arith.constant 0 : index
    %63 = vector.load %arg9[%c0_27, %c0_28, %c0_29] : memref<1x2x64xf32, #tpu.memory_space<vmem>>, vector<1x2x64xf32>
    tpu.vector_store %arg9[%c0_27, %c0_28, %c0_29], %62 {strides = array<i32>} : memref<1x2x64xf32, #tpu.memory_space<vmem>>, vector<1x2x64xf32>,
    return
  }
  func.func @transform_0(%arg0: i32) -> (i32, i32, i32) {
    %c0_i32 = arith.constant 0 : i32
    %c0_i32_0 = arith.constant 0 : i32
    %c0_i32_1 = arith.constant 0 : i32
    return %arg0, %c0_i32, %c0_i32_0 : i32, i32, i32
  }
  func.func @transform_1(%arg0: i32) -> (i32, i32) {
    %c0_i32 = arith.constant 0 : i32
    %c0_i32_0 = arith.constant 0 : i32
    %c0_i32_1 = arith.constant 0 : i32
    return %c0_i32, %c0_i32_0 : i32, i32
  }
  func.func @transform_2(%arg0: i32) -> (i32, i32) {
    %c0_i32 = arith.constant 0 : i32
    %c0_i32_0 = arith.constant 0 : i32
    %c0_i32_1 = arith.constant 0 : i32
    return %c0_i32, %c0_i32_0 : i32, i32
  }
  func.func @transform_3(%arg0: i32) -> (i32, i32) {
    %c0_i32 = arith.constant 0 : i32
    %c0_i32_0 = arith.constant 0 : i32
    %c0_i32_1 = arith.constant 0 : i32
    return %c0_i32, %c0_i32_0 : i32, i32
  }
  func.func @transform_4(%arg0: i32) -> (i32, i32) {
    %c0_i32 = arith.constant 0 : i32
    %c0_i32_0 = arith.constant 0 : i32
    %c0_i32_1 = arith.constant 0 : i32
    return %c0_i32, %c0_i32_0 : i32, i32
  }
  func.func @transform_5(%arg0: i32) -> (i32, i32) {
    %c0_i32 = arith.constant 0 : i32
    %c0_i32_0 = arith.constant 0 : i32
    %c0_i32_1 = arith.constant 0 : i32
    return %c0_i32, %c0_i32_0 : i32, i32
  }
  func.func @transform_6(%arg0: i32) -> (i32, i32) {
    %c0_i32 = arith.constant 0 : i32
    %c0_i32_0 = arith.constant 0 : i32
    %c0_i32_1 = arith.constant 0 : i32
    return %c0_i32, %c0_i32_0 : i32, i32
  }
  func.func @transform_7(%arg0: i32) -> (i32, i32) {
    %c0_i32 = arith.constant 0 : i32
    %c0_i32_0 = arith.constant 0 : i32
    %c0_i32_1 = arith.constant 0 : i32
    return %c0_i32, %c0_i32_0 : i32, i32
  }
  func.func @transform_8(%arg0: i32) -> (i32, i32, i32) {
    %c0_i32 = arith.constant 0 : i32
    %c0_i32_0 = arith.constant 0 : i32
    %c0_i32_1 = arith.constant 0 : i32
    return %arg0, %c0_i32, %c0_i32_0 : i32, i32, i32
  }
}

</mosaic_0001>

<bundles_post_ra>
// kernel: attention_pool_2d.1
= control target key start
LH: loop header
LB: loop body
LE: loop exit
PB: predicated region body
PF: predicated region fallthrough
CT: control target
= control target key end

     0   :  { %v2139_v2 = vmov 0   ;;  %vm135_vm0 = vcmask 523264   ;;  %s2796_s0 = inlined_call_operand.vmem [shape: bf16[2,64,64], index: 0, kind: input, shape index: {}]   ;;  %s2797_s1 = inlined_call_operand.vmem [shape: bf16[64,192], index: 1, kind: input, shape index: {}]   ;;  %s2798_s2 = inlined_call_operand.vmem [shape: f32[64,192], index: 2, kind: input, shape index: {}]   ;;  %s2799_s3 = inlined_call_operand.vmem [shape: f32[1,192], index: 3, kind: input, shape index: {}]   ;;  %s2800_s4 = inlined_call_operand.vmem [shape: f32[64,4], index: 4, kind: input, shape index: {}]   ;;  %s2801_s5 = inlined_call_operand.vmem [shape: f32[2,128], index: 5, kind: input, shape index: {}]   ;;  %s2802_s6 = inlined_call_operand.vmem [shape: bf16[64,64], index: 6, kind: input, shape index: {}]   ;;  %s2803_s7 = inlined_call_operand.vmem [shape: f32[1,64], index: 7, kind: input, shape index: {}]   ;;  %s2804_s8 = inlined_call_operand.hbm [shape: f32[1,2,64], index: 8, kind: output, shape index: {}]  }
   0x1   :  { %v2055_v0 = vld [vmem:[%s2797_s1 + $0x4] ss:$8 sps:$4 sm:$0xff]   ;;  %v2057_v1 = vld [vmem:[%s2797_s1] ss:$8 sps:$4 sm:$0xff]   ;;  %192 = vmatprep.mubr.bf16.mxu0 %v2139_v2  ;;  %v2058_v3 = vld [vmem:[%s2797_s1 + $0x14] ss:$8 sps:$4 sm:$0xff]  }
   0x2   :  { %160 = vmatprep.subr.bf16.mxu0 %v2055_v0  ;;  %v2060_v4 = vld [vmem:[%s2797_s1 + $0x10] ss:$8 sps:$4 sm:$0xff]   ;;  %v2061_v5 = vld [vmem:[%s2797_s1 + $0x24] ss:$8 sps:$4 sm:$0xff]   ;;  %v2063_v6 = vld [vmem:[%s2797_s1 + $0x20] ss:$8 sps:$4 sm:$0xff]  }
   0x3   :  { %161 = vmatpush1.bf16.msra.mxu0 %v2057_v1  ;;  %v2064_v7 = vld [vmem:[%s2797_s1 + $0x34] ss:$8 sps:$4 sm:$0xff]   ;;  %v2066_v8 = vld [vmem:[%s2797_s1 + $0x30] ss:$8 sps:$4 sm:$0xff]   ;;  %v2067_v9 = vld [vmem:[%s2796_s0] sm:$0xff]  }
   0x4   :  { %162 = vmatprep.subr.bf16.mxu0 %v2058_v3 }
   0x7   :  { %163 = vmatpush1.bf16.msra.mxu0 %v2060_v4 }
   0x8   :  { %164 = vmatprep.subr.bf16.mxu0 %v2061_v5 }
   0xb   :  { %165 = vmatpush1.bf16.msra.mxu0 %v2063_v6 }
   0xc   :  { %166 = vmatprep.subr.bf16.mxu0 %v2064_v7 }
   0xf   :  { %167 = vmatpush1.bf16.msra.mxu0 %v2066_v8 }
  0x10   :  { %13 = vsyncpa [#allocation3], 0  ;;  %v2068_v10 = vld [vmem:[%s2796_s0 + $0x8] sm:$0xff]   ;;  %v2069_v11 = vld [vmem:[%s2796_s0 + $0x10] sm:$0xff]   ;;  %v2140_v17 = vmov 0.0   ;;  %s2141_s21 = smov 64  }
  0x11   :  { %v2070_v12 = vld [vmem:[%s2796_s0 + $0x18] sm:$0xff]   ;;  %v2071_v13 = vld [vmem:[%s2796_s0 + $0x20] sm:$0xff]   ;;  %v2072_v14 = vld [vmem:[%s2796_s0 + $0x28] sm:$0xff]   ;;  %386 = vmatprep.mubr.f32.mxu1 %v2140_v17  ;;  %vm2143_vm1 = vmmov 0   ;;  %vm734_vm2 = vcmask 31744   ;;  %vm786_vm4 = vcmask 1041409  }
  0x12   :  { %1531 = vmatmul.mubr.msk.bf16.vlgmr.msra.gmra.mrb[0].mxu0 %vm135_vm0, %v2067_v9  ;;  %v2073_v15 = vld [vmem:[%s2796_s0 + $0x30] sm:$0xff]   ;;  %v2074_v16 = vld [vmem:[%s2796_s0 + $0x38] sm:$0xff]   ;;  %v2251_v18 = vld [vmem:[%s2798_s2] sm:$0xff]  ;;  %s2145_s23 = smov [#allocation2]   ;;  %vm1499_vm5 = vcmask 517120  }
  0x13   :  { %202 = vmatprep.mubr.bf16.mxu0 %v2139_v2  ;;  %v2256_v20 = vld [vmem:[%s2798_s2 + $0x10] sm:$0xff]  ;;  %v2264_v23 = vld [vmem:[%s2798_s2 + $0x8] sm:$0xff]  ;;  %v2269_v24 = vld [vmem:[%s2798_s2 + $0x18] sm:$0xff]  ;;  %s1507_s24 = sshll.u32 %s2145_s23, 4  ;;  %s1508_s24 = int_to_ptr.vmem [resolvable:$true] %s1507_s24 }
  0x14   :  { %v2281_v30 = vld [vmem:[%s2798_s2 + $0x20] sm:$0xff]  ;;  %v2290_v34 = vld [vmem:[%s2798_s2 + $0x30] sm:$0xff]  ;;  %v2298_v37 = vld [vmem:[%s2798_s2 + $0x28] sm:$0xff]  ;;  %s2115_s25 = scalar_lea.vmem %s1508_s24, 32  ;;  %p2120_p1 = scmp.lt.s32.totalorder %s1508_s24, %s1508_s24 }
  0x15   :  { %v2303_v38 = vld [vmem:[%s2798_s2 + $0x38] sm:$0xff]  ;;  %v2315_v45 = vld [vmem:[%s2798_s2 + $0x40] sm:$0xff]  ;;  %v2324_v48 = vld [vmem:[%s2798_s2 + $0x50] sm:$0xff]  ;;  %p2116_p0 = scmp.ne.s32.totalorder %s1508_s24, %s2115_s25  ;;  %p2121_p2 = scmp.lt.s32.totalorder %s2115_s25, %s2115_s25 }
  0x16   :  { %v2332_v51 = vld [vmem:[%s2798_s2 + $0x48] sm:$0xff]  ;;  %v2337_v52 = vld [vmem:[%s2798_s2 + $0x58] sm:$0xff]  ;;  %v2351_v59 = vld [vmem:[%s2798_s2 + $0x60] sm:$0xff] }
  0x17   :  { %v2358_v62 = vld [vmem:[%s2798_s2 + $0x70] sm:$0xff]  ;;  %v2366_v1 = vld [vmem:[%s2798_s2 + $0x68] sm:$0xff]  ;;  %vm2551_vm3 = vmpackc.low %vm734_vm2, %vm734_vm2  ;;  %p2122_p3 = por %p2121_p2, %p2120_p1 }
  0x19   :  { %p2123_p4 = pnand %p2122_p3, %p2116_p0 }
  0x1a   :  { %1532 = vmatmul.mubr.msk.bf16.gmra.mrb[4].mxu0 %vm135_vm0, %v2068_v10 }
  0x1b   :  { %212 = vmatprep.mubr.bf16.mxu0 %v2139_v2 }
  0x22   :  { %1533 = vmatmul.mubr.msk.bf16.gmra.mrb[8].mxu0 %vm135_vm0, %v2069_v11 }
  0x23   :  { %222 = vmatprep.mubr.bf16.mxu0 %v2139_v2 }
  0x2a   :  { %1534 = vmatmul.mubr.msk.bf16.gmra.mrb[12].mxu0 %vm135_vm0, %v2070_v12 }
  0x2b   :  { %232 = vmatprep.mubr.bf16.mxu0 %v2139_v2 }
  0x32   :  { %1535 = vmatmul.mubr.msk.bf16.gmra.mrb[16].mxu0 %vm135_vm0, %v2071_v13 }
  0x33   :  { %242 = vmatprep.mubr.bf16.mxu0 %v2139_v2 }
  0x3a   :  { %1536 = vmatmul.mubr.msk.bf16.gmra.mrb[20].mxu0 %vm135_vm0, %v2072_v14 }
  0x3b   :  { %252 = vmatprep.mubr.bf16.mxu0 %v2139_v2 }
  0x42   :  { %1537 = vmatmul.mubr.msk.bf16.gmra.mrb[24].mxu0 %vm135_vm0, %v2073_v15 }
  0x43   :  { %262 = vmatprep.mubr.bf16.mxu0 %v2139_v2  ;;  %v2371_v2 = vld [vmem:[%s2798_s2 + $0x78] sm:$0xff] }
  0x4a   :  { %1538 = vmatmul.mubr.msk.bf16.gmra.mrb[28].mxu0 %vm135_vm0, %v2074_v16 }
  0x4b   :  { %1756 = vmatprep.mubr.msk.f32.mxu0 %vm2143_vm1, %v2140_v17 }
  0xe5   :  { %v194_v19 = vpop.f32.mrb[0].mxu0 }
  0xe6   :  { %v2259_v21 = vadd.f32 %v2251_v18, %v194_v19  ;;  %v196_v22 = vpop.f32.mrb[1].mxu0 }
  0xe7   :  { %v198_v25 = vpop.f32.mrb[2].mxu0  ;;  %v290_v28 = vadd.f32 %v2264_v23, %v196_v22 }
  0xe8   :  { %v2272_v26 = vadd.f32 %v2256_v20, %v198_v25  ;;  %1281 = vrot.lane.b32.xlu0 %v2259_v21, %s2141_s21  ;;  %v200_v27 = vpop.f32.mrb[3].mxu0 }
  0xe9   :  { %v292_v29 = vadd.f32 %v2269_v24, %v200_v27 }
  0xea   :  { %v1902_v32 = vpack.c.bf16 %v2272_v26, %v2259_v21 }
  0xeb   :  { %v1900_v31 = vpack.c.bf16 %v292_v29, %v290_v28 }
  0xec   :  { %1283 = vrot.lane.b32.xlu0 %v2272_v26, %s2141_s21 }
  0xed   :  { %v204_v33 = vpop.f32.mrb[4].mxu0  ;;  %1901 = vmatprep.subr.bf16.mxu1 %v1900_v31 }
  0xee   :  { %v2293_v35 = vadd.f32 %v2281_v30, %v204_v33  ;;  %v206_v36 = vpop.f32.mrb[5].mxu0  ;;  %1903 = vmatpush1.bf16.msra.mxu1 %v1902_v32  ;;  %v410_v33 = vld [vmem:[%s2800_s4] sm:$0xff] }
  0xef   :  { %v208_v39 = vpop.f32.mrb[6].mxu0  ;;  %v294_v42 = vadd.f32 %v2298_v37, %v206_v36  ;;  %v412_v36 = vld [vmem:[%s2800_s4 + $0x10] sm:$0xff] }
  0xf0   :  { %v2306_v40 = vadd.f32 %v2290_v34, %v208_v39  ;;  %1285 = vrot.lane.b32.xlu1 %v2293_v35, %s2141_s21  ;;  %v210_v41 = vpop.f32.mrb[7].mxu0 }
  0xf1   :  { %v296_v43 = vadd.f32 %v2303_v38, %v210_v41  ;;  %v413_v41 = vld [vmem:[%s2800_s4 + $0x18] sm:$0xff] }
  0xf2   :  { %v1906_v46 = vpack.c.bf16 %v2306_v40, %v2293_v35 }
  0xf3   :  { %v1904_v44 = vpack.c.bf16 %v296_v43, %v294_v42 }
  0xf4   :  { %1287 = vrot.lane.b32.xlu1 %v2306_v40, %s2141_s21 }
  0xf5   :  { %v214_v47 = vpop.f32.mrb[8].mxu0  ;;  %1905 = vmatprep.subr.bf16.mxu1 %v1904_v44 }
  0xf6   :  { %v2327_v49 = vadd.f32 %v2315_v45, %v214_v47  ;;  %v216_v50 = vpop.f32.mrb[9].mxu0  ;;  %1907 = vmatpush1.bf16.msra.mxu1 %v1906_v46  ;;  %v2431_v46 = vpack.c.bf16 %v413_v41, %v412_v36 }
  0xf7   :  { %v218_v53 = vpop.f32.mrb[10].mxu0  ;;  %v298_v56 = vadd.f32 %v2332_v51, %v216_v50 }
  0xf8   :  { %v2340_v54 = vadd.f32 %v2324_v48, %v218_v53  ;;  %1289 = vrot.lane.b32.xlu0 %v2327_v49, %s2141_s21  ;;  %v220_v55 = vpop.f32.mrb[11].mxu0 }
  0xf9   :  { %v300_v57 = vadd.f32 %v2337_v52, %v220_v55 }
  0xfa   :  { %1291 = vrot.lane.b32.xlu1 %v2340_v54, %s2141_s21  ;;  %v1910_v60 = vpack.c.bf16 %v2340_v54, %v2327_v49 }
  0xfb   :  { %v1908_v58 = vpack.c.bf16 %v300_v57, %v298_v56 }
  0xfd   :  { %v224_v61 = vpop.f32.mrb[12].mxu0  ;;  %1909 = vmatprep.subr.bf16.mxu1 %v1908_v58 }
  0xfe   :  { %v2361_v63 = vadd.f32 %v2351_v59, %v224_v61  ;;  %v226_v0 = vpop.f32.mrb[13].mxu0  ;;  %1911 = vmatpush1.bf16.msra.mxu1 %v1910_v60 }
  0xff   :  { %v228_v3 = vpop.f32.mrb[14].mxu0  ;;  %v302_v6 = vadd.f32 %v2366_v1, %v226_v0 }
 0x100   :  { %v2374_v4 = vadd.f32 %v2358_v62, %v228_v3  ;;  %1293 = vrot.lane.b32.xlu0 %v2361_v63, %s2141_s21  ;;  %v230_v5 = vpop.f32.mrb[15].mxu0 }
 0x101   :  { %v304_v7 = vadd.f32 %v2371_v2, %v230_v5 }
 0x102   :  { %1295 = vrot.lane.b32.xlu1 %v2374_v4, %s2141_s21  ;;  %v1914_v9 = vpack.c.bf16 %v2374_v4, %v2361_v63 }
 0x103   :  { %v1912_v8 = vpack.c.bf16 %v304_v7, %v302_v6  ;;  %v416_v6 = vld [vmem:[%s2800_s4 + $0x30] sm:$0xff]  ;;  %v417_v7 = vld [vmem:[%s2800_s4 + $0x38] sm:$0xff] }
 0x105   :  { %v234_v10 = vpop.f32.mrb[16].mxu0  ;;  %1913 = vmatprep.subr.bf16.mxu1 %v1912_v8  ;;  %v2489_v8 = vpack.c.bf16 %v417_v7, %v416_v6 }
 0x106   :  { %v2385_v11 = vadd.f32 %v2251_v18, %v234_v10  ;;  %v236_v12 = vpop.f32.mrb[17].mxu0  ;;  %1915 = vmatpush1.bf16.msra.mxu1 %v1914_v9  ;;  %v397_v9 = vlaneseq }
 0x107   :  { %v238_v13 = vpop.f32.mrb[18].mxu0  ;;  %v306_v16 = vadd.f32 %v2264_v23, %v236_v12 }
 0x108   :  { %v2388_v14 = vadd.f32 %v2256_v20, %v238_v13  ;;  %1297 = vrot.lane.b32.xlu0 %v2385_v11, %s2141_s21  ;;  %v240_v15 = vpop.f32.mrb[19].mxu0  ;;  %v398_v10 = vshrl.u32 %v397_v9, 7  ;;  %v395_v13 = vld [vmem:[%s2799_s3] sm:$0x3] }
 0x109   :  { %v308_v19 = vadd.f32 %v2269_v24, %v240_v15 }
 0x10a   :  { %1299 = vrot.lane.b32.xlu1 %v2388_v14, %s2141_s21  ;;  %v1918_v18 = vpack.c.bf16 %v2388_v14, %v2385_v11  ;;  %v2498_v12 = vsub.s32 0, %v398_v10  ;;  %v403_v15 = vsub.s32 1, %v398_v10 }
 0x10b   :  { %v1916_v22 = vpack.c.bf16 %v308_v19, %v306_v16  ;;  %v2144_v16 = vmov 1966171168  }
 0x10c   :  { %v420_v19 = vunpack.c.l.s4 %v2144_v16 }
 0x10d   :  { %v244_v25 = vpop.f32.mrb[20].mxu0  ;;  %1917 = vmatprep.subr.bf16.mxu1 %v1916_v22  ;;  %v400_v22 = vrot.slane %v395_v13, %v2498_v12 }
 0x10e   :  { %v2399_v20 = vadd.f32 %v2281_v30, %v244_v25  ;;  %v246_v27 = vpop.f32.mrb[21].mxu0  ;;  %1919 = vmatpush1.bf16.msra.mxu1 %v1918_v18  ;;  %v404_v25 = vrot.slane %v395_v13, %v403_v15 }
 0x10f   :  { %v248_v28 = vpop.f32.mrb[22].mxu0  ;;  %v310_v24 = vadd.f32 %v2298_v37, %v246_v27  ;;  %v421_v27 = vunpack.c.0.s8 %v420_v19 }
 0x110   :  { %v2402_v29 = vadd.f32 %v2290_v34, %v248_v28  ;;  %1301 = vrot.lane.b32.xlu0 %v2399_v20, %s2141_s21  ;;  %v250_v23 = vpop.f32.mrb[23].mxu0  ;;  %v411_v34 = vld [vmem:[%s2800_s4 + $0x8] sm:$0xff] }
 0x111   :  { %v312_v31 = vadd.f32 %v2303_v38, %v250_v23  ;;  %v2142_v38 = vmov 0.0|0.0   ;;  %v2422_v39 = vpack.c.bf16 %v411_v34, %v410_v33 }
 0x112   :  { %1303 = vrot.lane.b32.xlu1 %v2402_v29, %s2141_s21  ;;  %v1922_v30 = vpack.c.bf16 %v2402_v29, %v2399_v20  ;;  %1948 = vmatprep.subr.bf16.mxu0 %v2142_v38 }
 0x113   :  { %v1920_v32 = vpack.c.bf16 %v312_v31, %v310_v24  ;;  %1950 = vmatpush3.bf16.msra.mxu0 %v2422_v39 }
 0x114   :  { %1951 = vmatprep.subr.bf16.mxu0 %v2142_v38 }
 0x115   :  { %v254_v37 = vpop.f32.mrb[24].mxu0  ;;  %1921 = vmatprep.subr.bf16.mxu1 %v1920_v32 }
 0x116   :  { %v2428_v42 = vadd.f32 %v2315_v45, %v254_v37  ;;  %v256_v43 = vpop.f32.mrb[25].mxu0  ;;  %1923 = vmatpush1.bf16.msra.mxu1 %v1922_v30  ;;  %v2504_v30 = vsub.s32 %v421_v27, %v398_v10 }
 0x117   :  { %v258_v44 = vpop.f32.mrb[26].mxu0  ;;  %v314_v53 = vadd.f32 %v2332_v51, %v256_v43  ;;  %1953 = vmatpush3.bf16.msra.mxu0 %v2431_v46 }
 0x118   :  { %v2434_v47 = vadd.f32 %v2324_v48, %v258_v44  ;;  %1305 = vrot.lane.b32.xlu0 %v2428_v42, %s2141_s21  ;;  %v260_v50 = vpop.f32.mrb[27].mxu0  ;;  %1954 = vmatprep.subr.bf16.mxu0 %v2142_v38 }
 0x119   :  { %v316_v45 = vadd.f32 %v2337_v52, %v260_v50 }
 0x11a   :  { %1307 = vrot.lane.b32.xlu1 %v2434_v47, %s2141_s21  ;;  %v1926_v48 = vpack.c.bf16 %v2434_v47, %v2428_v42 }
 0x11b   :  { %v1924_v55 = vpack.c.bf16 %v316_v45, %v314_v53 }
 0x11d   :  { %v264_v56 = vpop.f32.mrb[28].mxu0  ;;  %1925 = vmatprep.subr.bf16.mxu1 %v1924_v55 }
 0x11e   :  { %v2448_v57 = vadd.f32 %v2351_v59, %v264_v56  ;;  %v266_v58 = vpop.f32.mrb[29].mxu0  ;;  %1927 = vmatpush1.bf16.msra.mxu1 %v1926_v48 }
 0x11f   :  { %v268_v51 = vpop.f32.mrb[30].mxu0  ;;  %v318_v61 = vadd.f32 %v2366_v1, %v266_v58  ;;  %v414_v1 = vld [vmem:[%s2800_s4 + $0x20] sm:$0xff] }
 0x120   :  { %v2451_v52 = vadd.f32 %v2358_v62, %v268_v51  ;;  %1309 = vrot.lane.b32.xlu0 %v2448_v57, %s2141_s21  ;;  %v270_v60 = vpop.f32.mrb[31].mxu0  ;;  %v2464_v62 = vld [vmem:[%s2801_s5] sm:$0x3] }
 0x121   :  { %v320_v0 = vadd.f32 %v2371_v2, %v270_v60  ;;  %v415_v2 = vld [vmem:[%s2800_s4 + $0x28] sm:$0xff] }
 0x122   :  { %1311 = vrot.lane.b32.xlu1 %v2451_v52, %s2141_s21  ;;  %v1930_v59 = vpack.c.bf16 %v2451_v52, %v2448_v57  ;;  %v2477_v5 = vpack.c.bf16 %v415_v2, %v414_v1 }
 0x123   :  { %v1928_v3 = vpack.c.bf16 %v320_v0, %v318_v61 }
 0x124   :  { %1956 = vmatpush3.bf16.msra.mxu0 %v2477_v5 }
 0x125   :  { %1929 = vmatprep.subr.bf16.mxu1 %v1928_v3  ;;  %1957 = vmatprep.subr.bf16.mxu0 %v2142_v38 }
 0x126   :  { %1931 = vmatpush1.bf16.msra.mxu1 %v1930_v59 }
 0x127   :  { %1933 = vmatprep.subr.bf16.mxu1 %v2422_v39 }
 0x128   :  { %1959 = vmatpush3.bf16.msra.mxu0 %v2489_v8 }
 0x129   :  { %387 = vmatmul.mubr.f32.vlgmr.msra.gmra.mrb[0].mxu1 %v2464_v62  ;;  %1984 = vmatprep.subr.bf16.mxu0 %v2142_v38 }
 0x12a   :  { %1935 = vmatpush3.bf16.msra.mxu1 %v2422_v39 }
 0x12b   :  { %1937 = vmatprep.subr.bf16.mxu1 %v2431_v46 }
 0x12e   :  { %1939 = vmatpush3.bf16.msra.mxu1 %v2431_v46 }
 0x12f   :  { %1941 = vmatprep.subr.bf16.mxu1 %v2477_v5 }
 0x132   :  { %1943 = vmatpush3.bf16.msra.mxu1 %v2477_v5 }
 0x133   :  { %1945 = vmatprep.subr.bf16.mxu1 %v2489_v8 }
 0x136   :  { %1947 = vmatpush3.bf16.msra.mxu1 %v2489_v8 }
 0x137   :  { %1960 = vmatprep.subr.bf16.mxu1 %v2142_v38 }
 0x1fc   :  { %v388_v18 = vpop.f32.mrb[0].mxu1 }
 0x1fd   :  { %v393_v28 = vmul.f32 0.015625, %v388_v18  ;;  %v390_v23 = vpop.f32.mrb[1].mxu1 }
 0x1fe   :  { %v394_v24 = vmul.f32 0.015625, %v390_v23 }
 0x1ff   :  { %v407_v31 = vadd.f32 %v400_v22, %v393_v28 }
 0x200   :  { %v408_v32 = vadd.f32 %v404_v25, %v394_v24 }
 0x201   :  { %1261 = vrot.lane.b32.xlu0 %v407_v31, %s2141_s21 }
 0x202   :  { %v409_v33 = vmul.f32 0.25, %v408_v32 }
 0x204   :  { %v425_v34 = vrot.slane %v409_v33, %v2504_v30  ;;  %v660_v36 = vmul.f32 %v409_v33, %v407_v31 }
 0x206   :  { %v433_v37 = vrot.slane %v425_v34, %v2504_v30  ;;  %1757 = vmatmul.mubr.msk.f32.vlgmr.msra.gmra.mrb[32].mxu0 %vm135_vm0, %v660_v36  ;;  %v426_v50 = vcombine.high %v425_v34, %v425_v34 }
 0x207   :  { %1810 = vmatprep.mubr.msk.f32.mxu0 %vm2143_vm1, %v2140_v17  ;;  %1987 = vmatpush3.bf16.xpose.msk.msra.mxu0 %vm2551_vm3, %v2422_v39 }
 0x208   :  { %v444_v41 = vrot.slane %v433_v37, %v2498_v12  ;;  %v440_v55 = vrot.slane %v426_v50, %v2504_v30  ;;  %1988 = vmatprep.subr.bf16.mxu0 %v2142_v38 }
 0x20a   :  { %v451_v43 = vmul.f32 %v444_v41, %v2259_v21  ;;  %v452_v44 = vmul.f32 %v444_v41, %v2272_v26  ;;  %v453_v53 = vmul.f32 %v444_v41, %v2293_v35  ;;  %v454_v45 = vmul.f32 %v444_v41, %v2306_v40 }
 0x20b   :  { %v455_v48 = vmul.f32 %v444_v41, %v2327_v49  ;;  %v456_v21 = vmul.f32 %v444_v41, %v2340_v54  ;;  %v448_v26 = vrot.slane %v440_v55, %v2498_v12  ;;  %v457_v35 = vmul.f32 %v444_v41, %v2361_v63 }
 0x20c   :  { %1716 = vmatprep.mubr.msk.f32.mxu1 %vm135_vm0, %v451_v43  ;;  %v458_v40 = vmul.f32 %v444_v41, %v2374_v4 }
 0x20d   :  { %1717 = vmatmul.mubr.msk.f32.vlgmr.msra.gmra.mrb[2].mxu1 %vm135_vm0, %v452_v44  ;;  %v459_v56 = vmul.f32 %v448_v26, %v2385_v11  ;;  %v460_v49 = vmul.f32 %v448_v26, %v2388_v14  ;;  %v461_v54 = vmul.f32 %v448_v26, %v2399_v20  ;;  %v462_v63 = vmul.f32 %v448_v26, %v2402_v29 }
 0x20e   :  { %1719 = vmatprep.mubr.msk.f32.mxu1 %vm135_vm0, %v453_v53  ;;  %v463_v58 = vmul.f32 %v448_v26, %v2428_v42  ;;  %v464_v4 = vmul.f32 %v448_v26, %v2434_v47  ;;  %v465_v11 = vmul.f32 %v448_v26, %v2448_v57  ;;  %v466_v14 = vmul.f32 %v448_v26, %v2451_v52 }
 0x20f   :  { %1991 = vmatpush3.bf16.xpose.msk.msra.mxu0 %vm2551_vm3, %v2431_v46 }
 0x210   :  { %1992 = vmatprep.subr.bf16.mxu0 %v2142_v38 }
 0x211   :  { %1720 = vmatmul.mubr.msk.f32.gmra.mrb[4].mxu1 %vm135_vm0, %v454_v45 }
 0x212   :  { %1722 = vmatprep.mubr.msk.f32.mxu1 %vm135_vm0, %v455_v48 }
 0x215   :  { %1723 = vmatmul.mubr.msk.f32.gmra.mrb[6].mxu1 %vm135_vm0, %v456_v21 }
 0x216   :  { %1725 = vmatprep.mubr.msk.f32.mxu1 %vm135_vm0, %v457_v35 }
 0x217   :  { %1995 = vmatpush3.bf16.xpose.msk.msra.mxu0 %vm2551_vm3, %v2477_v5 }
 0x218   :  { %1996 = vmatprep.subr.bf16.mxu0 %v2142_v38 }
 0x219   :  { %1726 = vmatmul.mubr.msk.f32.gmra.mrb[8].mxu1 %vm135_vm0, %v458_v40 }
 0x21a   :  { %1728 = vmatprep.mubr.msk.f32.mxu1 %vm135_vm0, %v459_v56 }
 0x21d   :  { %1729 = vmatmul.mubr.msk.f32.gmra.mrb[10].mxu1 %vm135_vm0, %v460_v49 }
 0x21e   :  { %1731 = vmatprep.mubr.msk.f32.mxu1 %vm135_vm0, %v461_v54 }
 0x21f   :  { %1999 = vmatpush3.bf16.xpose.msk.msra.mxu0 %vm2551_vm3, %v2489_v8 }
 0x220   :  { %2024 = vmatprep.subr.bf16.mxu0 %v2142_v38 }
 0x221   :  { %1732 = vmatmul.mubr.msk.f32.gmra.mrb[12].mxu1 %vm135_vm0, %v462_v63 }
 0x222   :  { %1734 = vmatprep.mubr.msk.f32.mxu1 %vm135_vm0, %v463_v58 }
 0x225   :  { %1735 = vmatmul.mubr.msk.f32.gmra.mrb[14].mxu1 %vm135_vm0, %v464_v4 }
 0x226   :  { %1737 = vmatprep.mubr.msk.f32.mxu1 %vm135_vm0, %v465_v11 }
 0x229   :  { %1738 = vmatmul.mubr.msk.f32.gmra.mrb[16].mxu1 %vm135_vm0, %v466_v14 }
 0x22a   :  { %1791 = vmatprep.mubr.msk.f32.mxu1 %vm2143_vm1, %v2140_v17 }
 0x2d9   :  { %v2571_v29 = vpop.f32.mrb[32].mxu0 }
 0x2da   :  { %v1758_v42 = vpop.f32.mrb[33].mxu0 }
 0x2e0   :  { %v2573_v47 = vpop.f32.mrb[2].mxu1 }
 0x2e1   :  { %v581_v57 = vpop.f32.mrb[3].mxu1  ;;  %v736_v52 = vsel %vm734_vm2, %v2573_v47, -inf }
 0x2e2   :  { %v735_v0 = vsel %vm734_vm2, %v581_v57, -inf }
 0x2e4   :  { %v2575_v51 = vpop.f32.mrb[4].mxu1 }
 0x2e5   :  { %v739_v60 = vsel %vm734_vm2, %v2575_v51, -inf  ;;  %v591_v61 = vpop.f32.mrb[5].mxu1 }
 0x2e6   :  { %v740_v3 = vmax.f32 %v736_v52, %v739_v60  ;;  %v737_v59 = vsel %vm734_vm2, %v591_v61, -inf }
 0x2e7   :  { %v738_v1 = vmax.f32 %v735_v0, %v737_v59 }
 0x2e8   :  { %v2583_v2 = vpop.f32.mrb[6].mxu1 }
 0x2e9   :  { %v743_v6 = vsel %vm734_vm2, %v2583_v2, -inf  ;;  %v601_v7 = vpop.f32.mrb[7].mxu1 }
 0x2ea   :  { %v744_v9 = vmax.f32 %v740_v3, %v743_v6  ;;  %v741_v10 = vsel %vm734_vm2, %v601_v7, -inf }
 0x2eb   :  { %v742_v13 = vmax.f32 %v738_v1, %v741_v10 }
 0x2ec   :  { %v2588_v15 = vpop.f32.mrb[8].mxu1 }
 0x2ed   :  { %v747_v16 = vsel %vm734_vm2, %v2588_v15, -inf  ;;  %v611_v19 = vpop.f32.mrb[9].mxu1 }
 0x2ee   :  { %v748_v22 = vmax.f32 %v744_v9, %v747_v16  ;;  %v745_v18 = vsel %vm734_vm2, %v611_v19, -inf }
 0x2ef   :  { %v746_v25 = vmax.f32 %v742_v13, %v745_v18 }
 0x2f0   :  { %v2593_v27 = vpop.f32.mrb[10].mxu1 }
 0x2f1   :  { %v749_v28 = vmax.f32 %v746_v25, %v748_v22  ;;  %v2595_v23 = vpop.f32.mrb[11].mxu1  ;;  %v757_v33 = vsel %vm734_vm2, %v2593_v27, -inf }
 0x2f2   :  { %v756_v37 = vsel %vm734_vm2, %v2595_v23, -inf }
 0x2f3   :  { %v750_v24 = vrot.slane %v749_v28, 4 }
 0x2f4   :  { %v2597_v31 = vpop.f32.mrb[12].mxu1 }
 0x2f5   :  { %v751_v32 = vmax.f32 %v749_v28, %v750_v24  ;;  %v760_v34 = vsel %vm734_vm2, %v2597_v31, -inf  ;;  %v2603_v36 = vpop.f32.mrb[13].mxu1 }
 0x2f6   :  { %v761_v41 = vmax.f32 %v757_v33, %v760_v34  ;;  %v758_v43 = vsel %vm734_vm2, %v2603_v36, -inf }
 0x2f7   :  { %v752_v44 = vrot.slane %v751_v32, 2  ;;  %v759_v50 = vmax.f32 %v756_v37, %v758_v43 }
 0x2f8   :  { %v2609_v53 = vpop.f32.mrb[14].mxu1 }
 0x2f9   :  { %v753_v45 = vmax.f32 %v751_v32, %v752_v44  ;;  %v764_v55 = vsel %vm734_vm2, %v2609_v53, -inf  ;;  %v2613_v48 = vpop.f32.mrb[15].mxu1 }
 0x2fa   :  { %v765_v21 = vmax.f32 %v761_v41, %v764_v55  ;;  %v762_v26 = vsel %vm734_vm2, %v2613_v48, -inf }
 0x2fb   :  { %v754_v35 = vrot.slane %v753_v45, 1  ;;  %v763_v40 = vmax.f32 %v759_v50, %v762_v26 }
 0x2fc   :  { %v2617_v56 = vpop.f32.mrb[16].mxu1 }
 0x2fd   :  { %v755_v49 = vmax.f32 %v753_v45, %v754_v35  ;;  %v768_v54 = vsel %vm734_vm2, %v2617_v56, -inf  ;;  %v2621_v63 = vpop.f32.mrb[17].mxu1 }
 0x2fe   :  { %v769_v58 = vmax.f32 %v765_v21, %v768_v54  ;;  %v766_v4 = vsel %vm734_vm2, %v2621_v63, -inf }
 0x2ff   :  { %v781_v11 = vmax.f32 %v755_v49, %v2571_v29  ;;  %v767_v14 = vmax.f32 %v763_v40, %v766_v4 }
 0x301   :  { %v795_v42 = vrot.slane %v781_v11, %v2498_v12  ;;  %v770_v52 = vmax.f32 %v767_v14, %v769_v58 }
 0x303   :  { %v806_v60 = vsub.f32 %v611_v19, %v795_v42  ;;  %v771_v0 = vrot.slane %v770_v52, 4  ;;  %v800_v3 = vsub.f32 %v581_v57, %v795_v42  ;;  %v801_v59 = vsub.f32 %v2573_v47, %v795_v42 }
 0x304   :  { %v802_v1 = vsub.f32 %v591_v61, %v795_v42  ;;  %v803_v6 = vsub.f32 %v2575_v51, %v795_v42  ;;  %v804_v9 = vsub.f32 %v601_v7, %v795_v42  ;;  %v805_v10 = vsub.f32 %v2583_v2, %v795_v42 }
 0x305   :  { %v772_v13 = vmax.f32 %v770_v52, %v771_v0  ;;  %v816_v16 = vmul.f32 1.442695, %v800_v3  ;;  %v818_v22 = vmul.f32 1.442695, %v801_v59  ;;  %v807_v25 = vsub.f32 %v2588_v15, %v795_v42 }
 0x306   :  { %v820_v18 = vmul.f32 1.442695, %v802_v1  ;;  %v822_v24 = vmul.f32 1.442695, %v803_v6  ;;  %v824_v57 = vmul.f32 1.442695, %v804_v9 }
 0x307   :  { %v773_v28 = vrot.slane %v772_v13, 2  ;;  %2079 = vpow2.f32 %v816_v16  ;;  %v826_v61 = vmul.f32 1.442695, %v805_v10  ;;  %v778_v51 = vrot.slane %v2571_v29, 1 }
 0x308   :  { %2081 = vpow2.f32 %v818_v22  ;;  %v828_v7 = vmul.f32 1.442695, %v806_v60  ;;  %v830_v32 = vmul.f32 1.442695, %v807_v25 }
 0x309   :  { %v774_v19 = vmax.f32 %v772_v13, %v773_v28  ;;  %2083 = vpow2.f32 %v820_v18 }
 0x30a   :  { %2085 = vpow2.f32 %v822_v24 }
 0x30b   :  { %v775_v47 = vrot.slane %v774_v19, 1  ;;  %2087 = vpow2.f32 %v824_v57 }
 0x30c   :  { %2089 = vpow2.f32 %v826_v61 }
 0x30d   :  { %v776_v2 = vmax.f32 %v774_v19, %v775_v47  ;;  %2091 = vpow2.f32 %v828_v7 }
 0x30e   :  { %2093 = vpow2.f32 %v830_v32 }
 0x30f   :  { %v782_v33 = vmax.f32 %v776_v2, %v778_v51 }
 0x311   :  { %v799_v15 = vrot.slane %v782_v33, %v2498_v12  ;;  %v2633_v34 = vpop.eup %2079  ;;  %v785_v37 = vrot.slane %v782_v33, 7 }
 0x312   :  { %v2635_v41 = vpop.eup %2081 }
 0x313   :  { %v814_v43 = vsub.f32 %v2621_v63, %v799_v15  ;;  %v808_v44 = vsub.f32 %v2595_v23, %v799_v15  ;;  %v809_v50 = vsub.f32 %v2593_v27, %v799_v15  ;;  %v810_v45 = vsub.f32 %v2603_v36, %v799_v15  ;;  %v2641_v55 = vpop.eup %2083 }
 0x314   :  { %v1961_v21 = vpack.c.bf16 %v2635_v41, %v2633_v34  ;;  %v811_v26 = vsub.f32 %v2597_v31, %v799_v15  ;;  %v812_v35 = vsub.f32 %v2613_v48, %v799_v15  ;;  %v813_v40 = vsub.f32 %v2609_v53, %v799_v15  ;;  %v2648_v49 = vpop.eup %2085 }
 0x315   :  { %v832_v54 = vmul.f32 1.442695, %v808_v44  ;;  %v834_v63 = vmul.f32 1.442695, %v809_v50  ;;  %v815_v23 = vsub.f32 %v2617_v56, %v799_v15  ;;  %v836_v27 = vmul.f32 1.442695, %v810_v45  ;;  %v2653_v4 = vpop.eup %2087 }
 0x316   :  { %1962 = vmatpush3.bf16.msra.mxu1 %v1961_v21  ;;  %v838_v36 = vmul.f32 1.442695, %v811_v26  ;;  %v787_v58 = vsel %vm786_vm4, %v785_v37, %v781_v11  ;;  %v1964_v31 = vpack.c.bf16 %v2648_v49, %v2641_v55  ;;  %v2658_v48 = vpop.eup %2089  ;;  %v840_v56 = vmul.f32 1.442695, %v812_v35 }
 0x317   :  { %1963 = vmatprep.subr.bf16.mxu1 %v2142_v38  ;;  %2095 = vpow2.f32 %v832_v54  ;;  %v789_v53 = vsub.f32 %v2571_v29, %v787_v58  ;;  %v2660_v14 = vpop.eup %2091  ;;  %v842_v11 = vmul.f32 1.442695, %v813_v40  ;;  %v1967_v52 = vpack.c.bf16 %v2658_v48, %v2653_v4  ;;  %v2075_v40 = vld [vmem:[%s2802_s6] sm:$0xff]   ;;  %v2077_v54 = vld [vmem:[%s2802_s6 + $0x10] sm:$0xff]   ;;  %v1286_v58 = vpop.permute.xlu1 %1285 }
 0x318   :  { %2097 = vpow2.f32 %v834_v63  ;;  %v2663_v42 = vpop.eup %2093  ;;  %v844_v60 = vmul.f32 1.442695, %v814_v43  ;;  %v846_v29 = vmul.f32 1.442695, %v815_v23  ;;  %v2078_v63 = vld [vmem:[%s2802_s6 + $0x18] sm:$0xff]  }
 0x319   :  { %2099 = vpow2.f32 %v836_v27  ;;  %v1970_v0 = vpack.c.bf16 %v2663_v42, %v2660_v14  ;;  %v1282_v27 = vpop.permute.xlu0 %1281 }
 0x31a   :  { %1965 = vmatpush3.bf16.msra.mxu1 %v1964_v31  ;;  %2101 = vpow2.f32 %v838_v36 }
 0x31b   :  { %1966 = vmatprep.subr.bf16.mxu1 %v2142_v38  ;;  %2103 = vpow2.f32 %v840_v56 }
 0x31c   :  { %2105 = vpow2.f32 %v842_v11 }
 0x31d   :  { %2107 = vpow2.f32 %v844_v60 }
 0x31e   :  { %1968 = vmatpush3.bf16.msra.mxu1 %v1967_v52  ;;  %2109 = vpow2.f32 %v846_v29 }
 0x31f   :  { %1969 = vmatprep.subr.bf16.mxu1 %v2142_v38 }
 0x321   :  { %v2670_v3 = vpop.eup %2095 }
 0x322   :  { %1971 = vmatpush3.bf16.msra.mxu1 %v1970_v0  ;;  %v2672_v59 = vpop.eup %2097 }
 0x323   :  { %1972 = vmatprep.subr.bf16.mxu1 %v2142_v38  ;;  %v2675_v1 = vpop.eup %2099  ;;  %v1973_v6 = vpack.c.bf16 %v2672_v59, %v2670_v3 }
 0x324   :  { %v2679_v9 = vpop.eup %2101 }
 0x325   :  { %v2104_v10 = vpop.eup %2103  ;;  %v1976_v13 = vpack.c.bf16 %v2679_v9, %v2675_v1 }
 0x326   :  { %1974 = vmatpush3.bf16.msra.mxu1 %v1973_v6  ;;  %v2684_v16 = vpop.eup %2105 }
 0x327   :  { %1975 = vmatprep.subr.bf16.mxu1 %v2142_v38  ;;  %v2108_v22 = vpop.eup %2107  ;;  %v1979_v18 = vpack.c.bf16 %v2684_v16, %v2104_v10 }
 0x328   :  { %v2110_v25 = vpop.eup %2109 }
 0x329   :  { %v1982_v28 = vpack.c.bf16 %v2110_v25, %v2108_v22 }
 0x32a   :  { %1977 = vmatpush3.bf16.msra.mxu1 %v1976_v13 }
 0x32b   :  { %1978 = vmatprep.subr.bf16.mxu1 %v2142_v38 }
 0x32e   :  { %1980 = vmatpush3.bf16.msra.mxu1 %v1979_v18 }
 0x32f   :  { %1981 = vmatprep.subr.bf16.mxu1 %v2142_v38 }
 0x332   :  { %1983 = vmatpush3.bf16.msra.mxu1 %v1982_v28 }
 0x333   :  { %2002 = vmatprep.subr.msk.bf16.mxu1 %vm2551_vm3, %v2422_v39 }
 0x335   :  { %1792 = vmatmul.mubr.f32.vlgmr.msra.gmra.mrb[18].mxu1 %v2464_v62 }
 0x33b   :  { %2005 = vmatpush3.bf16.xpose.msk.msra.mxu1 %vm2551_vm3, %v2422_v39  ;;  %v790_v39 = vmul.f32 1.442695, %v789_v53 }
 0x33c   :  { %2008 = vmatprep.subr.msk.bf16.mxu1 %vm2551_vm3, %v2431_v46 }
 0x33d   :  { %2111 = vpow2.f32 %v790_v39 }
 0x343   :  { %2011 = vmatpush3.bf16.xpose.msk.msra.mxu1 %vm2551_vm3, %v2431_v46 }
 0x344   :  { %2014 = vmatprep.subr.msk.bf16.mxu1 %vm2551_vm3, %v2477_v5 }
 0x347   :  { %v2112_v46 = vpop.eup %2111 }
 0x34b   :  { %2017 = vmatpush3.bf16.xpose.msk.msra.mxu1 %vm2551_vm3, %v2477_v5 }
 0x34c   :  { %2020 = vmatprep.subr.msk.bf16.mxu1 %vm2551_vm3, %v2489_v8 }
 0x353   :  { %2023 = vmatpush3.bf16.xpose.msk.msra.mxu1 %vm2551_vm3, %v2489_v8 }
 0x354   :  { %1888 = vmatprep.subr.bf16.mxu1 %v2140_v17 }
 0x408   :  { %v914_v24 = vpop.f32.mrb[18].mxu1 }
 0x409   :  { %v918_v19 = vadd.f32 %v2112_v46, %v914_v24  ;;  %v1793_v57 = vpop.f32.mrb[19].mxu1 }
 0x40b   :  { %2113 = vrcp.f32 %v918_v19 }
 0x415   :  { %v2114_v47 = vpop.eup %2113 }
 0x416   :  { %v928_v5 = vrot.slane %v2114_v47, %v2504_v30  ;;  %v920_v61 = vmul.f32 %v2114_v47, %v2112_v46 }
 0x418   :  { %v936_v51 = vrot.slane %v928_v5, %v2504_v30  ;;  %1811 = vmatmul.mubr.msk.f32.vlgmr.msra.gmra.mrb[34].mxu0 %vm734_vm2, %v920_v61  ;;  %v929_v2 = vcombine.high %v928_v5, %v928_v5 }
 0x419   :  { %1885 = vmatprep.mubr.msk.f32.mxu0 %vm2143_vm1, %v2140_v17 }
 0x41a   :  { %v947_v8 = vrot.slane %v936_v51, %v2498_v12  ;;  %v943_v15 = vrot.slane %v929_v2, %v2504_v30 }
 0x41c   :  { %v954_v20 = vmul.f32 %v2633_v34, %v947_v8  ;;  %v955_v7 = vmul.f32 %v2635_v41, %v947_v8  ;;  %v956_v32 = vmul.f32 %v2641_v55, %v947_v8  ;;  %v957_v33 = vmul.f32 %v2648_v49, %v947_v8  ;;  %v2076_v49 = vld [vmem:[%s2802_s6 + $0x8] sm:$0xff]  }
 0x41d   :  { %v958_v37 = vmul.f32 %v2653_v4, %v947_v8  ;;  %v959_v34 = vmul.f32 %v2658_v48, %v947_v8  ;;  %v951_v41 = vrot.slane %v943_v15, %v2498_v12  ;;  %v960_v43 = vmul.f32 %v2660_v14, %v947_v8  ;;  %v1284_v4 = vpop.permute.xlu0 %1283  ;;  %v1288_v14 = vpop.permute.xlu1 %1287 }
 0x41e   :  { %1829 = vmatprep.mubr.msk.f32.mxu1 %vm734_vm2, %v954_v20  ;;  %v961_v44 = vmul.f32 %v2663_v42, %v947_v8 }
 0x41f   :  { %1830 = vmatmul.mubr.msk.f32.vlgmr.msra.gmra.mrb[20].mxu1 %vm734_vm2, %v955_v7  ;;  %v962_v30 = vmul.f32 %v2670_v3, %v951_v41  ;;  %v963_v50 = vmul.f32 %v2672_v59, %v951_v41  ;;  %v964_v45 = vmul.f32 %v2675_v1, %v951_v41  ;;  %v965_v12 = vmul.f32 %v2679_v9, %v951_v41 }
 0x420   :  { %1832 = vmatprep.mubr.msk.f32.mxu1 %vm734_vm2, %v956_v32  ;;  %v966_v55 = vmul.f32 %v2104_v10, %v951_v41  ;;  %v967_v21 = vmul.f32 %v2684_v16, %v951_v41  ;;  %v968_v26 = vmul.f32 %v2108_v22, %v951_v41  ;;  %v969_v35 = vmul.f32 %v2110_v25, %v951_v41 }
 0x421   :  { %1889 = vmatpush3.bf16.msra.mxu1 %v2075_v40  ;;  %v1290_v59 = vpop.permute.xlu0 %1289 }
 0x422   :  { %1890 = vmatprep.subr.bf16.mxu1 %v2140_v17 }
 0x423   :  { %1833 = vmatmul.mubr.msk.f32.gmra.mrb[22].mxu1 %vm734_vm2, %v957_v33 }
 0x424   :  { %1835 = vmatprep.mubr.msk.f32.mxu1 %vm734_vm2, %v958_v37 }
 0x425   :  { %1891 = vmatpush3.bf16.msra.mxu1 %v2076_v49  ;;  %v1294_v22 = vpop.permute.xlu0 %1293 }
 0x426   :  { %1892 = vmatprep.subr.bf16.mxu1 %v2140_v17 }
 0x427   :  { %1836 = vmatmul.mubr.msk.f32.gmra.mrb[24].mxu1 %vm734_vm2, %v959_v34 }
 0x428   :  { %1838 = vmatprep.mubr.msk.f32.mxu1 %vm734_vm2, %v960_v43 }
 0x429   :  { %1893 = vmatpush3.bf16.msra.mxu1 %v2077_v54  ;;  %v1298_v19 = vpop.permute.xlu0 %1297 }
 0x42a   :  { %1894 = vmatprep.subr.bf16.mxu1 %v2140_v17 }
 0x42b   :  { %1839 = vmatmul.mubr.msk.f32.gmra.mrb[26].mxu1 %vm734_vm2, %v961_v44 }
 0x42c   :  { %1841 = vmatprep.mubr.msk.f32.mxu1 %vm734_vm2, %v962_v30 }
 0x42d   :  { %1895 = vmatpush3.bf16.msra.mxu1 %v2078_v63  ;;  %v1302_v20 = vpop.permute.xlu0 %1301 }
 0x42f   :  { %1842 = vmatmul.mubr.msk.f32.gmra.mrb[28].mxu1 %vm734_vm2, %v963_v50 }
 0x430   :  { %1844 = vmatprep.mubr.msk.f32.mxu1 %vm734_vm2, %v964_v45 }
 0x431   :  { %v1306_v34 = vpop.permute.xlu0 %1305 }
 0x433   :  { %1845 = vmatmul.mubr.msk.f32.gmra.mrb[30].mxu1 %vm734_vm2, %v965_v12 }
 0x434   :  { %1847 = vmatprep.mubr.msk.f32.mxu1 %vm734_vm2, %v966_v55 }
 0x435   :  { %v1310_v12 = vpop.permute.xlu0 %1309 }
 0x437   :  { %1848 = vmatmul.mubr.msk.f32.gmra.mrb[32].mxu1 %vm734_vm2, %v967_v21 }
 0x438   :  { %1850 = vmatprep.mubr.msk.f32.mxu1 %vm734_vm2, %v968_v26 }
 0x439   :  { %v1262_v40 = vpop.permute.xlu0 %1261 }
 0x43b   :  { %1851 = vmatmul.mubr.msk.f32.gmra.mrb[34].mxu1 %vm734_vm2, %v969_v35 }
 0x43c   :  { %1896 = vmatprep.mubr.msk.bf16.mxu1 %vm2143_vm1, %v2140_v17  ;;  %v1292_v17 = vpop.permute.xlu1 %1291 }
 0x440   :  { %v1296_v10 = vpop.permute.xlu1 %1295 }
 0x444   :  { %v1300_v39 = vpop.permute.xlu1 %1299 }
 0x448   :  { %v1304_v61 = vpop.permute.xlu1 %1303 }
 0x44c   :  { %v1308_v33 = vpop.permute.xlu1 %1307 }
 0x450   :  { %v1312_v30 = vpop.permute.xlu1 %1311 }
 0x4eb   :  { %v2769_v23 = vpop.f32.mrb[34].mxu0 }
 0x4ec   :  { %v1812_v36 = vpop.f32.mrb[35].mxu0  ;;  %v1264_v49 = vmul.f32 %v1262_v40, %v2769_v23 }
 0x4f2   :  { %v1831_v31 = vpop.f32.mrb[20].mxu1 }
 0x4f3   :  { %v1330_v53 = vmul.f32 %v1831_v31, %v1284_v4  ;;  %v1181_v48 = vpop.f32.mrb[21].mxu1 }
 0x4f4   :  { %v1329_v56 = vmul.f32 %v1282_v27, %v1181_v48 }
 0x4f6   :  { %v2025_v11 = vpack.c.bf16 %v1330_v53, %v1329_v56  ;;  %v1834_v42 = vpop.f32.mrb[22].mxu1 }
 0x4f7   :  { %v1332_v52 = vmul.f32 %v1834_v42, %v1288_v14  ;;  %v1191_v60 = vpop.f32.mrb[23].mxu1 }
 0x4f8   :  { %v1331_v29 = vmul.f32 %v1286_v58, %v1191_v60  ;;  %2026 = vmatpush3.bf16.msra.mxu0 %v2025_v11  ;;  %v1589_v58 = vld [vmem:[%s2803_s7] ss:$0 sm:$0xff] }
 0x4f9   :  { %2027 = vmatprep.subr.bf16.mxu0 %v2142_v38 }
 0x4fa   :  { %v2028_v0 = vpack.c.bf16 %v1332_v52, %v1331_v29  ;;  %v1837_v3 = vpop.f32.mrb[24].mxu1 }
 0x4fb   :  { %v1334_v1 = vmul.f32 %v1837_v3, %v1292_v17  ;;  %v1201_v6 = vpop.f32.mrb[25].mxu1 }
 0x4fc   :  { %v1333_v9 = vmul.f32 %v1290_v59, %v1201_v6  ;;  %2029 = vmatpush3.bf16.msra.mxu0 %v2028_v0 }
 0x4fd   :  { %2030 = vmatprep.subr.bf16.mxu0 %v2142_v38 }
 0x4fe   :  { %v2031_v13 = vpack.c.bf16 %v1334_v1, %v1333_v9  ;;  %v1840_v16 = vpop.f32.mrb[26].mxu1 }
 0x4ff   :  { %v1336_v18 = vmul.f32 %v1840_v16, %v1296_v10  ;;  %v1211_v25 = vpop.f32.mrb[27].mxu1 }
 0x500   :  { %v1335_v28 = vmul.f32 %v1294_v22, %v1211_v25  ;;  %2032 = vmatpush3.bf16.msra.mxu0 %v2031_v13 }
 0x501   :  { %2033 = vmatprep.subr.bf16.mxu0 %v2142_v38 }
 0x502   :  { %v2034_v46 = vpack.c.bf16 %v1336_v18, %v1335_v28  ;;  %v1843_v24 = vpop.f32.mrb[28].mxu1 }
 0x503   :  { %v1338_v57 = vmul.f32 %v1843_v24, %v1300_v39  ;;  %v1221_v47 = vpop.f32.mrb[29].mxu1 }
 0x504   :  { %v1337_v5 = vmul.f32 %v1298_v19, %v1221_v47  ;;  %2035 = vmatpush3.bf16.msra.mxu0 %v2034_v46 }
 0x505   :  { %2036 = vmatprep.subr.bf16.mxu0 %v2142_v38 }
 0x506   :  { %v2037_v51 = vpack.c.bf16 %v1338_v57, %v1337_v5  ;;  %v1846_v8 = vpop.f32.mrb[30].mxu1 }
 0x507   :  { %v1340_v7 = vmul.f32 %v1846_v8, %v1304_v61  ;;  %v1231_v2 = vpop.f32.mrb[31].mxu1 }
 0x508   :  { %v1339_v32 = vmul.f32 %v1302_v20, %v1231_v2  ;;  %2038 = vmatpush3.bf16.msra.mxu0 %v2037_v51 }
 0x509   :  { %2039 = vmatprep.subr.bf16.mxu0 %v2142_v38 }
 0x50a   :  { %v2040_v15 = vpack.c.bf16 %v1340_v7, %v1339_v32  ;;  %v1849_v37 = vpop.f32.mrb[32].mxu1 }
 0x50b   :  { %v1342_v41 = vmul.f32 %v1849_v37, %v1308_v33  ;;  %v1241_v43 = vpop.f32.mrb[33].mxu1 }
 0x50c   :  { %v1341_v44 = vmul.f32 %v1306_v34, %v1241_v43  ;;  %2041 = vmatpush3.bf16.msra.mxu0 %v2040_v15 }
 0x50d   :  { %2042 = vmatprep.subr.bf16.mxu0 %v2142_v38 }
 0x50e   :  { %v2043_v50 = vpack.c.bf16 %v1342_v41, %v1341_v44  ;;  %v1852_v45 = vpop.f32.mrb[34].mxu1 }
 0x50f   :  { %v1344_v55 = vmul.f32 %v1852_v45, %v1312_v30  ;;  %v1251_v21 = vpop.f32.mrb[35].mxu1 }
 0x510   :  { %v1343_v26 = vmul.f32 %v1310_v12, %v1251_v21  ;;  %2044 = vmatpush3.bf16.msra.mxu0 %v2043_v50 }
 0x511   :  { %2045 = vmatprep.subr.bf16.mxu0 %v2142_v38 }
 0x512   :  { %v2046_v35 = vpack.c.bf16 %v1344_v55, %v1343_v26 }
 0x514   :  { %2047 = vmatpush3.bf16.msra.mxu0 %v2046_v35 }
 0x517   :  { %1886 = vmatmul.mubr.f32.vlgmr.msra.gmra.mrb[36].mxu0 %v2464_v62 }
 0x5ea   :  { %v1411_v54 = vpop.f32.mrb[36].mxu0 }
 0x5eb   :  { %v1415_v63 = vadd.f32 %v1411_v54, %v1264_v49  ;;  %v1887_v27 = vpop.f32.mrb[37].mxu0 }
 0x5ed   :  { %v1416_v36 = vpack.c.bf16 %v1415_v63, %v1415_v63 }
 0x5ef   :  { %1897 = vmatmul.mubr.msk.bf16.vlgmr.msra.gmra.mrb[36].mxu1 %vm135_vm0, %v1416_v36 }
 0x6c2   :  { %v1493_v38 = vpop.f32.mrb[36].mxu1 }
 0x6c3   :  { %v1494_v4 = vadd.f32 %v1589_v58, %v1493_v38  ;;  %v1898_v31 = vpop.f32.mrb[37].mxu1 }
 0x6c4   :  { %v1496_v62 = vpop.f32.mrb[38].mxu1 }
 0x6c5   :  { %v1899_v53 = vpop.f32.mrb[39].mxu1  ;;  %1500 = vst.msk [vmem:[#allocation2] sm:$0x3] %vm1499_vm5, %v1494_v4 }
 0x6c6   :  { %2126 = shalt.err (!%p2123_p4)
}
 0x6c7   :  { %s2127_s7 = scalar_lea.hbm %s2804_s8, 32 }
 0x6c8   :  { %p2128_p5 = scmp.ne.s32.totalorder %s2804_s8, %s2127_s7  ;;  %p2131_p6 = scmp.lt.u32.totalorder %s2127_s7, %s2804_s8 }
 0x6ca   :  { %p2133_p7 = pnand %p2131_p6, %p2128_p5 }
 0x6cc   :  { %2136 = shalt.err (!%p2133_p7)
}
 0x6cd   :  { %1510 = dma.vmem_to_hbm [thread:$0]  %s1508_s24, 32, %s2804_s8, [#allocation3]  }
 0x6ce   :  { %2137 = dma.done.wait [#allocation3], 32  }
 0x6cf   :  { %2138 = vsyncadd [#allocation3], 4294967264 }
 0x6d0   :  { %1514 = vsyncpa [#allocation3], 1 }

</bundles_post_ra>
